<compile_context>
chip_gen: v5e
topology: v5e:2x2
jax: 0.10.0
libtpu: 0.0.40
codegen_flags: <defaults>
</compile_context>

<pallas_src>
import functools

import jax
import jax.numpy as jnp
from jax.experimental import pallas as pl
from jax.experimental.pallas import tpu as pltpu

DROPOUT_P = 0.3


def _round_up(x, m):
    return ((x + m - 1) // m) * m


def _linear_kernel(x_ref, w_ref, b_ref, o_ref):
    """Eval path: o = x @ W + b (no dropout work at all)."""
    o = jnp.dot(x_ref[...], w_ref[...], preferred_element_type=jnp.float32)
    o = o + b_ref[...].astype(jnp.float32)  # (1, C_pad) broadcasts over rows
    o_ref[...] = o.astype(o_ref.dtype)


def _dropout_linear_kernel(x_ref, m_ref, w_ref, b_ref, o_ref):
    """Train path: o = (x * keep_mask) @ (W * 1/(1-p)) + b.

    The 1/(1-p) scale is already folded into W by the wrapper, so the only
    elementwise work here is one multiply per element of the x tile.
    """
    x = x_ref[...] * m_ref[...]
    o = jnp.dot(x, w_ref[...], preferred_element_type=jnp.float32)
    o = o + b_ref[...].astype(jnp.float32)
    o_ref[...] = o.astype(o_ref.dtype)


@functools.partial(jax.jit, static_argnames=("train",))
def ner_head(sentence_embedded, weight, bias, *, train=False, rng_key=None):
    """sentence_embedded: [B, S, H]; weight: [H, C]; bias: [C].

    Equivalent to PyTorch `self.linear(self.dropout(sentence_embedded))` with
    dropout active only when `train=True`.
    """
    B, S, H = sentence_embedded.shape
    C = weight.shape[1]
    M = B * S

    # Lane-dense output: pad class dim up to 128 lanes (avoids masked stores and
    # a badly underfilled MXU N dimension); sliced back to C after the call.
    C_pad = _round_up(C, 128)

    # Token-axis tile: big enough to hit HBM roofline, small enough that
    # double-buffered input + resident W/b + output buffers fit comfortably in
    # v7x's 64 MiB VMEM (TILE_M=1024, H=768 f32 -> 3 MiB per input buffer).
    TILE_M = min(1024, _round_up(M, 8))
    grid = (pl.cdiv(M, TILE_M),)

    x2d = sentence_embedded.reshape(M, H)
    out_dtype = x2d.dtype

    w = weight
    if train:
        # Fold the inverted-dropout scale into the weight at trace time:
        # O(H*C) one-time multiply instead of O(M*H) per-element work in-kernel.
        w = w * jnp.asarray(1.0 / (1.0 - DROPOUT_P), w.dtype)

    # Pad weight/bias class dim to C_pad lanes (extra columns are zero).
    w_p = jnp.zeros((H, C_pad), w.dtype).at[:, :C].set(w)
    b_p = jnp.zeros((1, C_pad), jnp.float32).at[:, :C].set(
        bias.astype(jnp.float32))

    x_spec = pl.BlockSpec((TILE_M, H), lambda i: (i, 0))
    w_spec = pl.BlockSpec((H, C_pad), lambda i: (0, 0))      # resident
    b_spec = pl.BlockSpec((1, C_pad), lambda i: (0, 0))      # resident
    o_spec = pl.BlockSpec((TILE_M, C_pad), lambda i: (i, 0))

    # Independent row-tiles -> mark the M axis parallel (2x on v7x megacore);
    # only attach TPU compiler params when actually lowering for TPU.
    compiler_params = None
    if jax.default_backend() == "tpu":
        compiler_params = pltpu.CompilerParams(
            dimension_semantics=("parallel",))

    if train:
        if rng_key is None:
            rng_key = jax.random.PRNGKey(0)
        keep = jax.random.bernoulli(
            rng_key, 1.0 - DROPOUT_P, (M, H)).astype(x2d.dtype)
        out2d = pl.pallas_call(
            _dropout_linear_kernel,
            out_shape=jax.ShapeDtypeStruct((M, C_pad), out_dtype),
            grid=grid,
            in_specs=[x_spec, x_spec, w_spec, b_spec],
            out_specs=o_spec,
            compiler_params=compiler_params,
        )(x2d, keep, w_p, b_p)
    else:
        out2d = pl.pallas_call(
            _linear_kernel,
            out_shape=jax.ShapeDtypeStruct((M, C_pad), out_dtype),
            grid=grid,
            in_specs=[x_spec, w_spec, b_spec],
            out_specs=o_spec,
            compiler_params=compiler_params,
        )(x2d, w_p, b_p)

    return out2d[:, :C].reshape(B, S, C)


if __name__ == "__main__":
    # Small, deterministic synthetic setup consistent with the module's forward:
    # encoder token embeddings [B, S, hidden_size], linear hidden_size->n_classes.
    B, S, H, C = 2, 8, 32, 9
    key = jax.random.PRNGKey(0)
    k_x, k_w, k_b, k_d = jax.random.split(key, 4)

    # Stand-in for sentence_transformer(input_text) token-level output.
    x = jax.random.normal(k_x, (B, S, H), dtype=jnp.float32)

    # nn.Linear(H, C)-style deterministic init: U(-1/sqrt(H), 1/sqrt(H)).
    bound = 1.0 / (H ** 0.5)
    w = jax.random.uniform(k_w, (H, C), minval=-bound, maxval=bound,
                           dtype=jnp.float32)
    b = jax.random.uniform(k_b, (C,), minval=-bound, maxval=bound,
                           dtype=jnp.float32)

    # Eval-mode forward (dropout = identity), matching PyTorch .eval() semantics.
    out = jax.block_until_ready(ner_head(x, w, b, train=False))
    ref = (x.reshape(B * S, H) @ w + b).reshape(B, S, C)
    assert out.shape == (B, S, C)
    assert jnp.allclose(out, ref, atol=1e-5, rtol=1e-5), "eval mismatch vs ref"

    # Train-mode forward: in-kernel masked matmul, checked against plain JAX
    # inverted-dropout reference using the same mask.
    out_train = jax.block_until_ready(ner_head(x, w, b, train=True,
                                               rng_key=k_d))
    keep = jax.random.bernoulli(k_d, 1.0 - DROPOUT_P,
                                (B * S, H)).astype(jnp.float32)
    ref_t = ((x.reshape(B * S, H) * keep / (1.0 - DROPOUT_P)) @ w + b)
    ref_t = ref_t.reshape(B, S, C)
    assert out_train.shape == (B, S, C)
    assert jnp.allclose(out_train, ref_t, atol=1e-4, rtol=1e-4), \
        "train mismatch vs ref"

    print("KERNEL_OK")
</pallas_src>

<mosaic_0001>
module attributes {stable_mosaic.version = 11 : i64} {
  func.func @_linear_kernel(%arg0: i32, %arg1: memref<16x32xf32, #tpu.memory_space<vmem>>, %arg2: memref<32x128xf32, #tpu.memory_space<vmem>>, %arg3: memref<1x128xf32, #tpu.memory_space<vmem>>, %arg4: memref<16x128xf32, #tpu.memory_space<vmem>>) attributes {dimension_semantics = [#tpu.dimension_semantics<arbitrary>], iteration_bounds = array<i64: 1>, scalar_prefetch = 0 : i64, scratch_operands = 0 : i64, tpu.core_type = #tpu.core_type<tc>, window_params = [{transform_indices = @transform_0, window_bounds = array<i64: 16, 32>}, {pipeline_mode = #tpu.pipeline_mode<synchronous>, transform_indices = @transform_1, window_bounds = array<i64: 32, 128>}, {pipeline_mode = #tpu.pipeline_mode<synchronous>, transform_indices = @transform_2, window_bounds = array<i64: 1, 128>}, {transform_indices = @transform_3, window_bounds = array<i64: 16, 128>}]} {
    %c0 = arith.constant 0 : index
    %c0_0 = arith.constant 0 : index
    %0 = vector.load %arg1[%c0, %c0_0] : memref<16x32xf32, #tpu.memory_space<vmem>>, vector<16x32xf32>
    %c0_1 = arith.constant 0 : index
    %c0_2 = arith.constant 0 : index
    %1 = vector.load %arg2[%c0_1, %c0_2] : memref<32x128xf32, #tpu.memory_space<vmem>>, vector<32x128xf32>
    %cst = arith.constant dense<0.000000e+00> : vector<16x128xf32>
    %2 = tpu.matmul %0, %1, %cst {dimension_numbers = #tpu.dot_dimension_numbers<[1], [0], [0], [1], [0, 0, 1, 1], [], []>} : vector<16x32xf32>, vector<32x128xf32>, vector<16x128xf32> -> vector<16x128xf32>
    %c0_3 = arith.constant 0 : index
    %c0_4 = arith.constant 0 : index
    %3 = vector.load %arg3[%c0_3, %c0_4] : memref<1x128xf32, #tpu.memory_space<vmem>>, vector<1x128xf32>
    %4 = vector.broadcast %3 : vector<1x128xf32> to vector<16x128xf32>
    %5 = arith.addf %2, %4 : vector<16x128xf32>
    %c0_5 = arith.constant 0 : index
    %c0_6 = arith.constant 0 : index
    %6 = vector.load %arg4[%c0_5, %c0_6] : memref<16x128xf32, #tpu.memory_space<vmem>>, vector<16x128xf32>
    tpu.vector_store %arg4[%c0_5, %c0_6], %5 {strides = array<i32>} : memref<16x128xf32, #tpu.memory_space<vmem>>, vector<16x128xf32>,
    return
  }
  func.func @transform_0(%arg0: i32) -> (i32, i32) {
    %c0_i32 = arith.constant 0 : i32
    %c0_i32_0 = arith.constant 0 : i32
    return %arg0, %c0_i32 : i32, i32
  }
  func.func @transform_1(%arg0: i32) -> (i32, i32) {
    %c0_i32 = arith.constant 0 : i32
    %c0_i32_0 = arith.constant 0 : i32
    %c0_i32_1 = arith.constant 0 : i32
    return %c0_i32, %c0_i32_0 : i32, i32
  }
  func.func @transform_2(%arg0: i32) -> (i32, i32) {
    %c0_i32 = arith.constant 0 : i32
    %c0_i32_0 = arith.constant 0 : i32
    %c0_i32_1 = arith.constant 0 : i32
    return %c0_i32, %c0_i32_0 : i32, i32
  }
  func.func @transform_3(%arg0: i32) -> (i32, i32) {
    %c0_i32 = arith.constant 0 : i32
    %c0_i32_0 = arith.constant 0 : i32
    return %arg0, %c0_i32 : i32, i32
  }
}

</mosaic_0001>

<bundles_post_ra>
// kernel: ner_head.1
= control target key start
LH: loop header
LB: loop body
LE: loop exit
PB: predicated region body
PF: predicated region fallthrough
CT: control target
= control target key end

     0   :  { %vm24_vm0 = vcmask 261120   ;;  %s114_s1 = inlined_call_operand.vmem [shape: f32[32,128], index: 1, kind: input, shape index: {}]   ;;  %s115_s2 = inlined_call_operand.vmem [shape: f32[1,128], index: 2, kind: input, shape index: {}]   ;;  %s116_s0 = inlined_call_operand.vmem [shape: f32[16,32], index: 0, kind: input, shape index: {}]   ;;  %s117_s3 = inlined_call_operand.vmem [shape: f32[16,128], index: 3, kind: output, shape index: {}]  }
   0x1   :  { %v19_v0 = vld [vmem:[%s114_s1 + $0x18] sm:$0xff]  ;;  %v18_v1 = vld [vmem:[%s114_s1 + $0x10] sm:$0xff]  ;;  %v17_v2 = vld [vmem:[%s114_s1 + $0x8] sm:$0xff] }
   0x2   :  { %43 = vmatpush.msra.mxu0 %v19_v0  ;;  %62 = vmatpush.msra.mxu1 %v19_v0  ;;  %v16_v3 = vld [vmem:[%s114_s1] sm:$0xff]  ;;  %v15_v5 = vld [vmem:[%s116_s0 + $0x8] sm:$0xff] }
   0x3   :  { %v14_v4 = vld [vmem:[%s116_s0] sm:$0xff] }
   0x4   :  { %44 = vmatpush.msra.mxu0 %v18_v1  ;;  %63 = vmatpush.msra.mxu1 %v18_v1  ;;  %v66_v6 = vld [vmem:[%s115_s2] ss:$0 sm:$0xff] }
   0x6   :  { %45 = vmatpush.msra.mxu0 %v17_v2  ;;  %64 = vmatpush.msra.mxu1 %v17_v2 }
   0x8   :  { %46 = vmatpush.msra.mxu0 %v16_v3  ;;  %65 = vmatpush.msra.mxu1 %v16_v3 }
   0x9   :  { %60 = vmatmul.msk.f32.vlgmr.msra.gmra.mxu0 %vm24_vm0, %v14_v4  ;;  %61 = vmatmul.msk.f32.vlgmr.msra.gmra.mxu1 %vm24_vm0, %v15_v5 }
  0x86   :  { %v48_v7 = vpop.f32.mrf.mxu0  ;;  %v51_v8 = vpop.f32.mrf.mxu1 }
  0x87   :  { %v49_v9 = vadd.f32 %v66_v6, %v48_v7  ;;  %v52_v10 = vadd.f32 %v66_v6, %v51_v8 }
  0x89   :  { %54 = vst [vmem:[%s117_s3] sm:$0xff] %v49_v9 }
  0x8a   :  { %55 = vst [vmem:[%s117_s3 + $0x8] sm:$0xff] %v52_v10 }

</bundles_post_ra>
